<compile_context>
chip_gen: v6e
topology: v6e:2x2x1
jax: 0.10.0
libtpu: 0.0.40
codegen_flags: <defaults>
</compile_context>

<pallas_src>
import functools

import jax
import jax.numpy as jnp
from jax.experimental import pallas as pl
from jax.experimental.pallas import tpu as pltpu

EPS = 1e-5                   # nn.InstanceNorm2d default
_MIN_GRID_STEPS = 8          # give v7x's 2 TensorCores plenty of blocks to shard
_MIN_BLOCK_BYTES = 1 << 20   # don't shrink blocks below ~1 MiB (per-step overhead amortization)


def _instance_norm_kernel(x_ref, o_ref, *, inv_count):
    # x_ref block: (block_rows, cols); each row is one (n, c) instance's flattened
    # spatial plane. cols is never tiled, so a row sum is the full per-instance sum.
    x = x_ref[...]
    xf = x.astype(jnp.float32)                       # no-op for f32 inputs
    s = jnp.sum(xf, axis=-1, keepdims=True)
    sq = jnp.sum(xf * xf, axis=-1, keepdims=True)
    mean = s * inv_count
    var = sq * inv_count - mean * mean               # biased variance, matches InstanceNorm2d
    # TODO(synk): E[x^2]-mean^2 loses precision when |mean| >> std; switch to a
    # two-pass / Welford variant if tighter accuracy is ever required.
    inv_std = jax.lax.rsqrt(jnp.maximum(var, 0.0) + EPS)
    shift = mean * inv_std                           # per-row scalar -> one fewer VPU op/element
    o_ref[...] = (xf * inv_std - shift).astype(o_ref.dtype)


def _vmem_caps():
    try:
        cap = pltpu.get_tpu_info().vmem_capacity_bytes
    except Exception:
        cap = 128 * 1024 * 1024
    # Half of physical VMEM: 64 MiB on v5e/v6e (128 MiB), 32 MiB on v7x (64 MiB/TC).
    return cap, min(cap // 2, 64 * 1024 * 1024)


def adaptive_instance_norm(x):
    """x: (N, C, H, W) -> (N, C, H, W); per-(n, c) spatial normalization (affine=False)."""
    N, C, H, W = x.shape
    rows = N * C
    cols = H * W
    x2d = x.reshape(rows, cols)                      # contiguous reshape: free

    itemsize = jnp.dtype(x.dtype).itemsize
    sublane = {4: 8, 2: 16, 1: 32}.get(itemsize, 8)

    # Per-row VMEM footprint of one pipelined grid step:
    #   2x input block + 2x output block (double-buffered, x.dtype)
    #   + ~2 block-sized f32 temporaries (upcast working copy / normalized result).
    bytes_per_row = cols * (4 * itemsize + 2 * 4)

    vmem_cap, vmem_limit = _vmem_caps()
    budget = int(0.75 * vmem_limit)                  # headroom for compiler scratch

    block_rows = max(1, budget // max(bytes_per_row, 1))
    block_rows = max(sublane, (block_rows // sublane) * sublane)

    # Prefer >= _MIN_GRID_STEPS grid steps so v7x's two TensorCores both get work,
    # but never shrink a block below ~1 MiB (fixed ~0.35 us per-step pipeline overhead).
    cap_rows = -(-rows // _MIN_GRID_STEPS)
    cap_rows = max(sublane, ((cap_rows + sublane - 1) // sublane) * sublane)
    if cap_rows * bytes_per_row >= _MIN_BLOCK_BYTES:
        block_rows = min(block_rows, cap_rows)

    block_rows = min(block_rows, rows)               # == rows (full extent) is always legal

    # Very large spatial planes: even the minimum-height block may exceed the budget;
    # raise the scoped VMEM limit toward physical capacity instead of failing.
    # TODO(synk): for planes beyond VMEM, tile the spatial axis with a second
    # 'arbitrary' grid axis (sum/sumsq accumulators + a second normalize pass).
    needed = block_rows * bytes_per_row
    if needed > budget:
        vmem_limit = min(int(needed / 0.75) + (1 << 20), int(0.9 * vmem_cap))

    grid = (pl.cdiv(rows, block_rows),)

    out2d = pl.pallas_call(
        functools.partial(_instance_norm_kernel, inv_count=1.0 / float(cols)),
        out_shape=jax.ShapeDtypeStruct((rows, cols), x.dtype),
        grid=grid,
        in_specs=[pl.BlockSpec((block_rows, cols), lambda i: (i, 0))],
        out_specs=pl.BlockSpec((block_rows, cols), lambda i: (i, 0)),
        compiler_params=pltpu.CompilerParams(
            dimension_semantics=("parallel",),
            vmem_limit_bytes=int(vmem_limit),
        ),
    )(x2d)

    return out2d.reshape(N, C, H, W)


def _reference(x):
    x32 = x.astype(jnp.float32)
    mean = jnp.mean(x32, axis=(2, 3), keepdims=True)
    var = jnp.var(x32, axis=(2, 3), keepdims=True)
    return ((x32 - mean) / jnp.sqrt(var + EPS)).astype(x.dtype)


if __name__ == "__main__":
    key = jax.random.PRNGKey(0)

    # Primary shape from the module spec: H*W = 256 (128-aligned lane dim).
    x = jax.random.normal(key, (2, 4, 16, 16), dtype=jnp.float32)
    out = adaptive_instance_norm(x)
    jax.block_until_ready(out)
    ref = _reference(x)
    assert out.shape == x.shape
    assert jnp.allclose(out, ref, atol=1e-5, rtol=1e-5)

    # Secondary shape exercising the unpadded, non-128-multiple lane path (7*7 = 49)
    # and a row count below the sublane count (2*3 = 6 -> full-extent row block).
    x2 = jax.random.normal(jax.random.PRNGKey(1), (2, 3, 7, 7), dtype=jnp.float32)
    out2 = adaptive_instance_norm(x2)
    jax.block_until_ready(out2)
    ref2 = _reference(x2)
    assert out2.shape == x2.shape
    assert jnp.allclose(out2, ref2, atol=1e-5, rtol=1e-5)

    print("KERNEL_OK")
</pallas_src>

<mosaic_0001>
module attributes {stable_mosaic.version = 11 : i64} {
  func.func @_instance_norm_kernel(%arg0: i32, %arg1: memref<8x256xf32, #tpu.memory_space<vmem>>, %arg2: memref<8x256xf32, #tpu.memory_space<vmem>>) attributes {dimension_semantics = [#tpu.dimension_semantics<parallel>], iteration_bounds = array<i64: 1>, scalar_prefetch = 0 : i64, scratch_operands = 0 : i64, tpu.core_type = #tpu.core_type<tc>, window_params = [{transform_indices = @transform_0, window_bounds = array<i64: 8, 256>}, {transform_indices = @transform_1, window_bounds = array<i64: 8, 256>}]} {
    %c0 = arith.constant 0 : index
    %c0_0 = arith.constant 0 : index
    %0 = vector.load %arg1[%c0, %c0_0] : memref<8x256xf32, #tpu.memory_space<vmem>>, vector<8x256xf32>
    %cst = arith.constant dense<0.000000e+00> : vector<8xf32>
    %1 = vector.multi_reduction <add>, %0, %cst [1] : vector<8x256xf32> to vector<8xf32>
    %2 = vector.shape_cast %1 : vector<8xf32> to vector<8x1xf32>
    %3 = arith.mulf %0, %0 : vector<8x256xf32>
    %cst_1 = arith.constant dense<0.000000e+00> : vector<8xf32>
    %4 = vector.multi_reduction <add>, %3, %cst_1 [1] : vector<8x256xf32> to vector<8xf32>
    %5 = vector.shape_cast %4 : vector<8xf32> to vector<8x1xf32>
    %cst_2 = arith.constant 3.906250e-03 : f32
    %6 = vector.broadcast %cst_2 : f32 to vector<8x1xf32>
    %7 = arith.mulf %2, %6 : vector<8x1xf32>
    %cst_3 = arith.constant 3.906250e-03 : f32
    %8 = vector.broadcast %cst_3 : f32 to vector<8x1xf32>
    %9 = arith.mulf %5, %8 : vector<8x1xf32>
    %10 = arith.mulf %7, %7 : vector<8x1xf32>
    %11 = arith.subf %9, %10 : vector<8x1xf32>
    %cst_4 = arith.constant 0.000000e+00 : f32
    %12 = vector.broadcast %cst_4 : f32 to vector<8x1xf32>
    %13 = arith.maximumf %11, %12 : vector<8x1xf32>
    %cst_5 = arith.constant 9.99999974E-6 : f32
    %14 = vector.broadcast %cst_5 : f32 to vector<8x1xf32>
    %15 = arith.addf %13, %14 : vector<8x1xf32>
    %16 = math.rsqrt %15 : vector<8x1xf32>
    %17 = arith.mulf %7, %16 : vector<8x1xf32>
    %18 = vector.broadcast %16 : vector<8x1xf32> to vector<8x256xf32>
    %19 = arith.mulf %0, %18 : vector<8x256xf32>
    %20 = vector.broadcast %17 : vector<8x1xf32> to vector<8x256xf32>
    %21 = arith.subf %19, %20 : vector<8x256xf32>
    %c0_6 = arith.constant 0 : index
    %c0_7 = arith.constant 0 : index
    %22 = vector.load %arg2[%c0_6, %c0_7] : memref<8x256xf32, #tpu.memory_space<vmem>>, vector<8x256xf32>
    tpu.vector_store %arg2[%c0_6, %c0_7], %21 {strides = array<i32>} : memref<8x256xf32, #tpu.memory_space<vmem>>, vector<8x256xf32>,
    return
  }
  func.func @transform_0(%arg0: i32) -> (i32, i32) {
    %c0_i32 = arith.constant 0 : i32
    %c0_i32_0 = arith.constant 0 : i32
    return %arg0, %c0_i32 : i32, i32
  }
  func.func @transform_1(%arg0: i32) -> (i32, i32) {
    %c0_i32 = arith.constant 0 : i32
    %c0_i32_0 = arith.constant 0 : i32
    return %arg0, %c0_i32 : i32, i32
  }
}

</mosaic_0001>

<bundles_post_ra>
// kernel: tpu_custom_call.1
= control target key start
LH: loop header
LB: loop body
LE: loop exit
PB: predicated region body
PF: predicated region fallthrough
CT: control target
= control target key end

     0   :  { %6 = vsyncpa [#allocation3], 0  ;;  %s126_s0 = inlined_call_operand.hbm [shape: f32[8,256], index: 0, kind: input, shape index: {}]   ;;  %s127_s1 = inlined_call_operand.hbm [shape: f32[8,256], index: 1, kind: output, shape index: {}]  }
   0x1   :  { %7 = vsyncpa [#allocation4], 0  ;;  %s108_s6 = smov [#allocation2]  }
   0x2   :  { %s14_s7 = sshll.u32 %s108_s6, 4  ;;  %s15_s7 = int_to_ptr.vmem [resolvable:$true] %s14_s7 }
   0x3   :  { %s72_s8 = scalar_lea.vmem %s15_s7, 256  ;;  %p77_p1 = scmp.lt.s32.totalorder %s15_s7, %s15_s7 }
   0x4   :  { %p73_p0 = scmp.ne.s32.totalorder %s15_s7, %s72_s8  ;;  %p78_p2 = scmp.lt.s32.totalorder %s72_s8, %s72_s8 }
   0x6   :  { %p79_p3 = por %p78_p2, %p77_p1 }
   0x8   :  { %p80_p4 = pnand %p79_p3, %p73_p0 }
   0xa   :  { %83 = shalt.err (!%p80_p4)
}
   0xb   :  { %17 = dma.hbm_to_vmem [thread:$0]  %s126_s0, 256, %s15_s7, [#allocation3]  }
   0xc   :  { %104 = dma.done.wait [#allocation3], 256  }
   0xd   :  { %105 = vsyncadd [#allocation3], 4294967040  ;;  %v21_v0 = vld [vmem:[#allocation2] sm:$0xff]  ;;  %v22_v1 = vld [vmem:[#allocation2 + $0x8] sm:$0xff]  ;;  %s109_s0 = smov [#allocation5]  }
   0xe   :  { %v23_v2 = vadd.f32 %v22_v1, %v21_v0  ;;  %v26_v3 = vmul.f32 %v21_v0, %v21_v0  ;;  %v27_v4 = vmul.f32 %v22_v1, %v22_v1  ;;  %s51_s11 = sshll.u32 %s109_s0, 4  ;;  %s52_s11 = int_to_ptr.vmem [resolvable:$true] %s51_s11 }
   0xf   :  { %s84_s12 = scalar_lea.vmem %s52_s11, 256  ;;  %p89_p6 = scmp.lt.s32.totalorder %s52_s11, %s52_s11 }
  0x10   :  { %24 = vadd.xlane.f32.xlu0 %v23_v2  ;;  %v28_v5 = vadd.f32 %v27_v4, %v26_v3  ;;  %p85_p5 = scmp.ne.s32.totalorder %s52_s11, %s84_s12  ;;  %p90_p7 = scmp.lt.s32.totalorder %s84_s12, %s84_s12 }
  0x12   :  { %p91_p8 = por %p90_p7, %p89_p6 }
  0x14   :  { %29 = vadd.xlane.f32.xlu0 %v28_v5  ;;  %p92_p9 = pnand %p91_p8, %p85_p5 }
  0x99   :  { %v25_v6 = vpop.xlane.xlu0 %24 }
  0x9a   :  { %v31_v7 = vmul.f32 0.00390625, %v25_v6 }
  0x9c   :  { %v33_v9 = vmul.f32 %v31_v7, %v31_v7 }
  0x9d   :  { %v30_v8 = vpop.xlane.xlu0 %29 }
  0x9e   :  { %v32_v10 = vmul.f32 0.00390625, %v30_v8 }
  0xa0   :  { %v34_v11 = vsub.f32 %v32_v10, %v33_v9 }
  0xa2   :  { %v35_v12 = vmax.f32 %v34_v11, 0.0 }
  0xa4   :  { %v36_v13 = vadd.f32 1e-05, %v35_v12 }
  0xa6   :  { %62 = vrsqrt.f32 %v36_v13 }
  0xb3   :  { %v63_v14 = vpop.eup %62 }
  0xb4   :  { %v38_v15 = vmul.f32 %v63_v14, %v31_v7  ;;  %v39_v16 = vmul.f32 %v63_v14, %v21_v0  ;;  %v40_v17 = vmul.f32 %v63_v14, %v22_v1 }
  0xb6   :  { %v41_v18 = vsub.f32 %v39_v16, %v38_v15  ;;  %v42_v19 = vsub.f32 %v40_v17, %v38_v15 }
  0xb8   :  { %43 = vst [vmem:[#allocation5] sm:$0xff] %v41_v18  ;;  %44 = vst [vmem:[#allocation5 + $0x8] sm:$0xff] %v42_v19 }
  0xb9   :  { %95 = shalt.err (!%p92_p9)
}
  0xba   :  { %54 = dma.vmem_to_hbm [thread:$0]  %s52_s11, 256, %s127_s1, [#allocation4]  }
  0xbb   :  { %106 = dma.done.wait [#allocation4], 256  }
  0xbc   :  { %107 = vsyncadd [#allocation4], 4294967040 }
  0xbd   :  { %58 = vsyncpa [#allocation3], 1 }
  0xbe   :  { %59 = vsyncpa [#allocation4], 1 }

</bundles_post_ra>
